<compile_context>
chip_gen: v5e
topology: v5e:2x2
jax: 0.10.0
libtpu: 0.0.40
codegen_flags: <defaults>
</compile_context>

<pallas_src>
import functools

import jax
import jax.numpy as jnp
from jax import lax
from jax.experimental import pallas as pl
from jax.experimental.pallas import tpu as pltpu


def _round_up(x, m):
    return ((x + m - 1) // m) * m


def _conv_stats_kernel(w_ref, p_ref, b_ref, y_ref, s1_ref, s2_ref,
                       acc1_ref, acc2_ref, *, ns_valid, tn):
    """Pass 1: conv-as-matmul + bias; accumulate per-channel sum / sumsq."""
    j = pl.program_id(0)

    @pl.when(j == 0)
    def _init():
        acc1_ref[...] = jnp.zeros_like(acc1_ref)
        acc2_ref[...] = jnp.zeros_like(acc2_ref)

    # MXU matmul with f32 accumulation (operands may be f32 or bf16).
    t = jnp.dot(w_ref[...], p_ref[...], preferred_element_type=jnp.float32)

    # Stats are accumulated on the *pre-bias* matmul result (a per-channel
    # shift), which reduces f32 cancellation in the E[t^2]-E[t]^2 variance.
    if ns_valid is not None:
        # NS is not a multiple of tn: mask padded columns out of the stats.
        col = lax.broadcasted_iota(jnp.int32, t.shape, 1) + j * tn
        t_stats = jnp.where(col < ns_valid, t, 0.0)
    else:
        t_stats = t
    acc1_ref[...] += jnp.sum(t_stats, axis=1, keepdims=True)
    acc2_ref[...] += jnp.sum(t_stats * t_stats, axis=1, keepdims=True)

    # Conv output (with bias), streamed back lane-dense (tn is a multiple of 128).
    y_ref[...] = t + b_ref[...]

    @pl.when(j == pl.num_programs(0) - 1)
    def _finalize():
        s1_ref[...] = acc1_ref[...]
        s2_ref[...] = acc2_ref[...]


def _bn_relu_kernel(y_ref, s1_ref, s2_ref, b_ref, g_ref, beta_ref, o_ref, *,
                    eps, inv_n):
    """Pass 2: BatchNorm (batch statistics) + affine + ReLU, per NS tile."""
    mean_t = s1_ref[...] * inv_n                         # (Cout_pad, 1)
    var = s2_ref[...] * inv_n - mean_t * mean_t          # biased var (torch train BN)
    var = jnp.maximum(var, 0.0)
    rstd = lax.rsqrt(var + eps)                          # EUP transcendental, f32
    scale = g_ref[...] * rstd
    shift = beta_ref[...] - (mean_t + b_ref[...]) * scale
    o_ref[...] = jnp.maximum(y_ref[...] * scale + shift, 0.0)


def conv3d_block_forward(x, weight, bias, gamma, beta, *, padding=1,
                         dilation=1, eps=1e-5, tn=512,
                         matmul_dtype=jnp.float32):
    """x: (N, Cin, D, H, W) f32; weight: (Cout, Cin, k, k, k); returns NCDHW.

    matmul_dtype: set to jnp.bfloat16 on v6e/v7x to halve patch HBM traffic and
    use the bf16-native MXU (f32 accumulation is kept either way).
    """
    N, Cin, D, H, W = x.shape
    Cout, Cin_w, k, _, _ = weight.shape
    assert Cin == Cin_w
    p, dil = padding, dilation

    Do = D + 2 * p - dil * (k - 1)
    Ho = H + 2 * p - dil * (k - 1)
    Wo = W + 2 * p - dil * (k - 1)
    S = Do * Ho * Wo
    NS = N * S
    K3 = k * k * k
    K = Cin * K3

    itemsize = jnp.dtype(matmul_dtype).itemsize
    # Sublane-aligned padding (8 for f32, 16 for bf16 packing). We do NOT pad
    # the contraction dim to 128: the patches matrix dominates HBM traffic and
    # zero rows only add bandwidth, not useful MXU work.
    k_mult = 16 if jnp.dtype(matmul_dtype) == jnp.dtype(jnp.bfloat16) else 8
    Kp = _round_up(K, k_mult)
    Cout_pad = _round_up(Cout, 8)

    # Lane tile along NS: >=128, multiple of 128, shrunk if the double-buffered
    # tiles would blow the scoped-VMEM budget (sized for v7x: 64 MiB physical,
    # 32 MiB default scoped limit).
    tn = min(_round_up(max(int(tn), 128), 128), _round_up(NS, 128))
    vmem_budget = 24 * 1024 * 1024

    def _tile_bytes(t):
        return (2 * (Kp * t * itemsize + Cout_pad * t * 4)
                + Cout_pad * Kp * itemsize)

    while tn > 128 and _tile_bytes(tn) > vmem_budget:
        tn -= 128

    NSp = _round_up(NS, tn)
    n_tiles = NSp // tn
    ns_valid = NS if NSp != NS else None

    # --- glue: im2col patch extraction (pure data rearrangement) ------------
    # Channel-major transpose BEFORE the k^3 expansion so patches come out
    # directly in (Cin*K3, N*S) order (no transpose of the 27x-sized array).
    xpad = jnp.pad(x, ((0, 0), (0, 0), (p, p), (p, p), (p, p)))
    xc = jnp.transpose(xpad, (1, 0, 2, 3, 4))            # (Cin, N, Dp, Hp, Wp)
    taps = []
    for kd in range(k):
        for kh in range(k):
            for kw in range(k):
                taps.append(xc[:, :,
                               kd * dil:kd * dil + Do,
                               kh * dil:kh * dil + Ho,
                               kw * dil:kw * dil + Wo])
    # (Cin, K3, N, Do, Ho, Wo) -> (Cin*K3, NS); tap ordering matches the
    # flattened weight layout (Cin slowest, then kd, kh, kw).
    patches = jnp.stack(taps, axis=1).reshape(K, NS).astype(matmul_dtype)
    patches = jnp.pad(patches, ((0, Kp - K), (0, NSp - NS)))
    # TODO(synk): the k^3=27x HBM expansion from host-side im2col is still the
    # dominant memory cost; removing it needs in-kernel tap formation from the
    # padded input (overlapping-window BlockSpecs / manual DMA), not done here.

    w2d = jnp.pad(weight.reshape(Cout, K).astype(matmul_dtype),
                  ((0, Cout_pad - Cout), (0, Kp - K)))
    b2d = jnp.pad(bias.astype(jnp.float32).reshape(Cout, 1),
                  ((0, Cout_pad - Cout), (0, 0)))
    g2d = jnp.pad(gamma.astype(jnp.float32).reshape(Cout, 1),
                  ((0, Cout_pad - Cout), (0, 0)))
    beta2d = jnp.pad(beta.astype(jnp.float32).reshape(Cout, 1),
                     ((0, Cout_pad - Cout), (0, 0)))

    chan_spec = pl.BlockSpec((Cout_pad, 1), lambda j: (0, 0))     # resident
    tile_spec = pl.BlockSpec((Cout_pad, tn), lambda j: (0, j))    # streamed

    # ---- pass 1: conv matmul + bias, per-channel sum / sumsq ---------------
    y_conv, s1, s2 = pl.pallas_call(
        functools.partial(_conv_stats_kernel, ns_valid=ns_valid, tn=tn),
        grid=(n_tiles,),
        in_specs=[
            pl.BlockSpec((Cout_pad, Kp), lambda j: (0, 0)),  # weights: resident
            pl.BlockSpec((Kp, tn), lambda j: (0, j)),        # patches: streamed
            chan_spec,                                       # conv bias
        ],
        out_specs=[
            tile_spec,                                       # conv output tiles
            chan_spec,                                       # per-channel sum
            chan_spec,                                       # per-channel sumsq
        ],
        out_shape=(
            jax.ShapeDtypeStruct((Cout_pad, NSp), jnp.float32),
            jax.ShapeDtypeStruct((Cout_pad, 1), jnp.float32),
            jax.ShapeDtypeStruct((Cout_pad, 1), jnp.float32),
        ),
        scratch_shapes=[pltpu.VMEM((Cout_pad, 1), jnp.float32),
                        pltpu.VMEM((Cout_pad, 1), jnp.float32)],
        compiler_params=pltpu.CompilerParams(
            # Stats accumulate across NS tiles -> sequential axis.
            # TODO(synk): on v7x (2 TCs) split NS across cores with per-core
            # partial sums combined in a tiny follow-up step.
            dimension_semantics=("arbitrary",),
            vmem_limit_bytes=32 * 1024 * 1024),
        cost_estimate=pl.CostEstimate(
            flops=2 * Cout_pad * Kp * NSp,
            transcendentals=0,
            bytes_accessed=(Kp * NSp * itemsize + Cout_pad * Kp * itemsize
                            + Cout_pad * NSp * 4)),
    )(w2d, patches, b2d)

    # ---- pass 2: BatchNorm (batch stats) + affine + ReLU, streamed ---------
    out2d = pl.pallas_call(
        functools.partial(_bn_relu_kernel, eps=eps, inv_n=1.0 / NS),
        grid=(n_tiles,),
        in_specs=[tile_spec, chan_spec, chan_spec, chan_spec, chan_spec,
                  chan_spec],
        out_specs=tile_spec,
        out_shape=jax.ShapeDtypeStruct((Cout_pad, NSp), jnp.float32),
        compiler_params=pltpu.CompilerParams(
            dimension_semantics=("parallel",),   # independent tiles (v7x 2-TC)
            vmem_limit_bytes=32 * 1024 * 1024),
        cost_estimate=pl.CostEstimate(
            flops=3 * Cout_pad * NSp,
            transcendentals=Cout_pad * n_tiles,
            bytes_accessed=2 * Cout_pad * NSp * 4),
    )(y_conv, s1, s2, b2d, g2d, beta2d)

    # --- glue: drop channel/spatial padding, back to NCDHW ------------------
    y = out2d[:Cout, :NS].reshape(Cout, N, Do, Ho, Wo)
    return jnp.transpose(y, (1, 0, 2, 3, 4))


def _reference(x, weight, bias, gamma, beta, *, padding=1, dilation=1, eps=1e-5):
    dn = lax.conv_dimension_numbers(x.shape, weight.shape,
                                    ("NCDHW", "OIDHW", "NCDHW"))
    y = lax.conv_general_dilated(
        x, weight, window_strides=(1, 1, 1),
        padding=[(padding, padding)] * 3,
        rhs_dilation=(dilation, dilation, dilation),
        dimension_numbers=dn)
    y = y + bias.reshape(1, -1, 1, 1, 1)
    mean = y.mean(axis=(0, 2, 3, 4), keepdims=True)
    var = ((y - mean) ** 2).mean(axis=(0, 2, 3, 4), keepdims=True)
    y = (y - mean) / jnp.sqrt(var + eps)
    y = y * gamma.reshape(1, -1, 1, 1, 1) + beta.reshape(1, -1, 1, 1, 1)
    return jnp.maximum(y, 0.0)


if __name__ == "__main__":
    # Small shapes consistent with Conv3dBlock(in_channels=3, n_kernels=4,
    # kernel_size=3, padding=1, dilation=1): NS = 2*8*8*8 = 1024 -> 2 NS tiles.
    N, Cin, Cout, k = 2, 3, 4, 3
    D = H = W = 8

    key = jax.random.PRNGKey(0)
    kx, kw, kb = jax.random.split(key, 3)

    x = jax.random.normal(kx, (N, Cin, D, H, W), dtype=jnp.float32)

    # Deterministic init mirroring PyTorch defaults:
    fan_in = Cin * k * k * k
    bound = 1.0 / jnp.sqrt(fan_in)
    weight = jax.random.uniform(kw, (Cout, Cin, k, k, k), jnp.float32,
                                minval=-bound, maxval=bound)
    bias = jax.random.uniform(kb, (Cout,), jnp.float32, minval=-bound,
                              maxval=bound)
    gamma = jnp.ones((Cout,), jnp.float32)   # BatchNorm3d affine weight
    beta = jnp.zeros((Cout,), jnp.float32)   # BatchNorm3d affine bias
    # TODO(synk): BN running-stats (momentum) updates are training-time state
    # mutation and do not affect the forward output; they are not modeled here.

    fwd = jax.jit(functools.partial(conv3d_block_forward, padding=1,
                                    dilation=1, tn=512,
                                    matmul_dtype=jnp.float32))
    # (On v6e/v7x, pass matmul_dtype=jnp.bfloat16 for bf16 MXU + halved patch
    #  traffic; kept f32 here so the exact-tolerance reference check passes.)
    out = fwd(x, weight, bias, gamma, beta)
    out = jax.block_until_ready(out)

    ref = _reference(x, weight, bias, gamma, beta, padding=1, dilation=1)
    assert out.shape == (N, Cout, D, H, W), out.shape
    assert jnp.allclose(out, ref, rtol=1e-4, atol=1e-4), (
        float(jnp.max(jnp.abs(out - ref))))

    print("KERNEL_OK")
</pallas_src>

<mosaic_0001>
module attributes {stable_mosaic.version = 11 : i64} {
  func.func @_conv_stats_kernel(%arg0: i32, %arg1: memref<8x88xf32, #tpu.memory_space<vmem>>, %arg2: memref<88x512xf32, #tpu.memory_space<vmem>>, %arg3: memref<8x1xf32, #tpu.memory_space<vmem>>, %arg4: memref<8x512xf32, #tpu.memory_space<vmem>>, %arg5: memref<8x1xf32, #tpu.memory_space<vmem>>, %arg6: memref<8x1xf32, #tpu.memory_space<vmem>>, %arg7: memref<8x1xf32, #tpu.memory_space<vmem>>, %arg8: memref<8x1xf32, #tpu.memory_space<vmem>>) attributes {dimension_semantics = [#tpu.dimension_semantics<arbitrary>], iteration_bounds = array<i64: 2>, scalar_prefetch = 0 : i64, scratch_operands = 2 : i64, tpu.core_type = #tpu.core_type<tc>, window_params = [{pipeline_mode = #tpu.pipeline_mode<synchronous>, transform_indices = @transform_0, window_bounds = array<i64: 8, 88>}, {transform_indices = @transform_1, window_bounds = array<i64: 88, 512>}, {pipeline_mode = #tpu.pipeline_mode<synchronous>, transform_indices = @transform_2, window_bounds = array<i64: 8, 1>}, {transform_indices = @transform_3, window_bounds = array<i64: 8, 512>}, {pipeline_mode = #tpu.pipeline_mode<synchronous>, transform_indices = @transform_4, window_bounds = array<i64: 8, 1>}, {pipeline_mode = #tpu.pipeline_mode<synchronous>, transform_indices = @transform_5, window_bounds = array<i64: 8, 1>}]} {
    %c0_i32 = arith.constant 0 : i32
    %0 = arith.cmpi eq, %arg0, %c0_i32 : i32
    %1 = arith.extui %0 : i1 to i32
    %c0_i32_0 = arith.constant 0 : i32
    %2 = arith.cmpi ne, %1, %c0_i32_0 : i32
    scf.if %2 {
      %cst_19 = arith.constant 0.000000e+00 : f32
      %24 = vector.broadcast %cst_19 : f32 to vector<8x1xf32>
      %c0_20 = arith.constant 0 : index
      %c0_21 = arith.constant 0 : index
      %25 = vector.load %arg7[%c0_20, %c0_21] : memref<8x1xf32, #tpu.memory_space<vmem>>, vector<8x1xf32>
      tpu.vector_store %arg7[%c0_20, %c0_21], %24 {strides = array<i32>} : memref<8x1xf32, #tpu.memory_space<vmem>>, vector<8x1xf32>,
      %cst_22 = arith.constant 0.000000e+00 : f32
      %26 = vector.broadcast %cst_22 : f32 to vector<8x1xf32>
      %c0_23 = arith.constant 0 : index
      %c0_24 = arith.constant 0 : index
      %27 = vector.load %arg8[%c0_23, %c0_24] : memref<8x1xf32, #tpu.memory_space<vmem>>, vector<8x1xf32>
      tpu.vector_store %arg8[%c0_23, %c0_24], %26 {strides = array<i32>} : memref<8x1xf32, #tpu.memory_space<vmem>>, vector<8x1xf32>,
    } else {
    }
    %c0 = arith.constant 0 : index
    %c0_1 = arith.constant 0 : index
    %3 = vector.load %arg1[%c0, %c0_1] : memref<8x88xf32, #tpu.memory_space<vmem>>, vector<8x88xf32>
    %c0_2 = arith.constant 0 : index
    %c0_3 = arith.constant 0 : index
    %4 = vector.load %arg2[%c0_2, %c0_3] : memref<88x512xf32, #tpu.memory_space<vmem>>, vector<88x512xf32>
    %cst = arith.constant dense<0.000000e+00> : vector<8x512xf32>
    %5 = tpu.matmul %3, %4, %cst {dimension_numbers = #tpu.dot_dimension_numbers<[1], [0], [0], [1], [0, 0, 1, 1], [], []>} : vector<8x88xf32>, vector<88x512xf32>, vector<8x512xf32> -> vector<8x512xf32>
    %c0_4 = arith.constant 0 : index
    %c0_5 = arith.constant 0 : index
    %6 = vector.load %arg7[%c0_4, %c0_5] : memref<8x1xf32, #tpu.memory_space<vmem>>, vector<8x1xf32>
    %cst_6 = arith.constant dense<0.000000e+00> : vector<8xf32>
    %7 = vector.multi_reduction <add>, %5, %cst_6 [1] : vector<8x512xf32> to vector<8xf32>
    %8 = vector.shape_cast %7 : vector<8xf32> to vector<8x1xf32>
    %9 = arith.addf %6, %8 : vector<8x1xf32>
    %c0_7 = arith.constant 0 : index
    %c0_8 = arith.constant 0 : index
    %10 = vector.load %arg7[%c0_7, %c0_8] : memref<8x1xf32, #tpu.memory_space<vmem>>, vector<8x1xf32>
    tpu.vector_store %arg7[%c0_7, %c0_8], %9 {strides = array<i32>} : memref<8x1xf32, #tpu.memory_space<vmem>>, vector<8x1xf32>,
    %c0_9 = arith.constant 0 : index
    %c0_10 = arith.constant 0 : index
    %11 = vector.load %arg8[%c0_9, %c0_10] : memref<8x1xf32, #tpu.memory_space<vmem>>, vector<8x1xf32>
    %12 = arith.mulf %5, %5 : vector<8x512xf32>
    %cst_11 = arith.constant dense<0.000000e+00> : vector<8xf32>
    %13 = vector.multi_reduction <add>, %12, %cst_11 [1] : vector<8x512xf32> to vector<8xf32>
    %14 = vector.shape_cast %13 : vector<8xf32> to vector<8x1xf32>
    %15 = arith.addf %11, %14 : vector<8x1xf32>
    %c0_12 = arith.constant 0 : index
    %c0_13 = arith.constant 0 : index
    %16 = vector.load %arg8[%c0_12, %c0_13] : memref<8x1xf32, #tpu.memory_space<vmem>>, vector<8x1xf32>
    tpu.vector_store %arg8[%c0_12, %c0_13], %15 {strides = array<i32>} : memref<8x1xf32, #tpu.memory_space<vmem>>, vector<8x1xf32>,
    %c0_14 = arith.constant 0 : index
    %c0_15 = arith.constant 0 : index
    %17 = vector.load %arg3[%c0_14, %c0_15] : memref<8x1xf32, #tpu.memory_space<vmem>>, vector<8x1xf32>
    %18 = vector.broadcast %17 : vector<8x1xf32> to vector<8x512xf32>
    %19 = arith.addf %5, %18 : vector<8x512xf32>
    %c0_16 = arith.constant 0 : index
    %c0_17 = arith.constant 0 : index
    %20 = vector.load %arg4[%c0_16, %c0_17] : memref<8x512xf32, #tpu.memory_space<vmem>>, vector<8x512xf32>
    tpu.vector_store %arg4[%c0_16, %c0_17], %19 {strides = array<i32>} : memref<8x512xf32, #tpu.memory_space<vmem>>, vector<8x512xf32>,
    %c1_i32 = arith.constant 1 : i32
    %21 = arith.cmpi eq, %arg0, %c1_i32 : i32
    %22 = arith.extui %21 : i1 to i32
    %c0_i32_18 = arith.constant 0 : i32
    %23 = arith.cmpi ne, %22, %c0_i32_18 : i32
    scf.if %23 {
      %c0_19 = arith.constant 0 : index
      %c0_20 = arith.constant 0 : index
      %24 = vector.load %arg7[%c0_19, %c0_20] : memref<8x1xf32, #tpu.memory_space<vmem>>, vector<8x1xf32>
      %c0_21 = arith.constant 0 : index
      %c0_22 = arith.constant 0 : index
      %25 = vector.load %arg5[%c0_21, %c0_22] : memref<8x1xf32, #tpu.memory_space<vmem>>, vector<8x1xf32>
      tpu.vector_store %arg5[%c0_21, %c0_22], %24 {strides = array<i32>} : memref<8x1xf32, #tpu.memory_space<vmem>>, vector<8x1xf32>,
      %c0_23 = arith.constant 0 : index
      %c0_24 = arith.constant 0 : index
      %26 = vector.load %arg8[%c0_23, %c0_24] : memref<8x1xf32, #tpu.memory_space<vmem>>, vector<8x1xf32>
      %c0_25 = arith.constant 0 : index
      %c0_26 = arith.constant 0 : index
      %27 = vector.load %arg6[%c0_25, %c0_26] : memref<8x1xf32, #tpu.memory_space<vmem>>, vector<8x1xf32>
      tpu.vector_store %arg6[%c0_25, %c0_26], %26 {strides = array<i32>} : memref<8x1xf32, #tpu.memory_space<vmem>>, vector<8x1xf32>,
    } else {
    }
    return
  }
  func.func @transform_0(%arg0: i32) -> (i32, i32) {
    %c0_i32 = arith.constant 0 : i32
    %c0_i32_0 = arith.constant 0 : i32
    %c0_i32_1 = arith.constant 0 : i32
    return %c0_i32, %c0_i32_0 : i32, i32
  }
  func.func @transform_1(%arg0: i32) -> (i32, i32) {
    %c0_i32 = arith.constant 0 : i32
    %c0_i32_0 = arith.constant 0 : i32
    return %c0_i32, %arg0 : i32, i32
  }
  func.func @transform_2(%arg0: i32) -> (i32, i32) {
    %c0_i32 = arith.constant 0 : i32
    %c0_i32_0 = arith.constant 0 : i32
    %c0_i32_1 = arith.constant 0 : i32
    return %c0_i32, %c0_i32_0 : i32, i32
  }
  func.func @transform_3(%arg0: i32) -> (i32, i32) {
    %c0_i32 = arith.constant 0 : i32
    %c0_i32_0 = arith.constant 0 : i32
    return %c0_i32, %arg0 : i32, i32
  }
  func.func @transform_4(%arg0: i32) -> (i32, i32) {
    %c0_i32 = arith.constant 0 : i32
    %c0_i32_0 = arith.constant 0 : i32
    %c0_i32_1 = arith.constant 0 : i32
    return %c0_i32, %c0_i32_0 : i32, i32
  }
  func.func @transform_5(%arg0: i32) -> (i32, i32) {
    %c0_i32 = arith.constant 0 : i32
    %c0_i32_0 = arith.constant 0 : i32
    %c0_i32_1 = arith.constant 0 : i32
    return %c0_i32, %c0_i32_0 : i32, i32
  }
}

module attributes {stable_mosaic.version = 11 : i64} {
  func.func @_bn_relu_kernel(%arg0: i32, %arg1: memref<8x512xf32, #tpu.memory_space<vmem>>, %arg2: memref<8x1xf32, #tpu.memory_space<vmem>>, %arg3: memref<8x1xf32, #tpu.memory_space<vmem>>, %arg4: memref<8x1xf32, #tpu.memory_space<vmem>>, %arg5: memref<8x1xf32, #tpu.memory_space<vmem>>, %arg6: memref<8x1xf32, #tpu.memory_space<vmem>>, %arg7: memref<8x512xf32, #tpu.memory_space<vmem>>) attributes {dimension_semantics = [#tpu.dimension_semantics<parallel>], iteration_bounds = array<i64: 2>, scalar_prefetch = 0 : i64, scratch_operands = 0 : i64, tpu.core_type = #tpu.core_type<tc>, window_params = [{transform_indices = @transform_0, window_bounds = array<i64: 8, 512>}, {pipeline_mode = #tpu.pipeline_mode<synchronous>, transform_indices = @transform_1, window_bounds = array<i64: 8, 1>}, {pipeline_mode = #tpu.pipeline_mode<synchronous>, transform_indices = @transform_2, window_bounds = array<i64: 8, 1>}, {pipeline_mode = #tpu.pipeline_mode<synchronous>, transform_indices = @transform_3, window_bounds = array<i64: 8, 1>}, {pipeline_mode = #tpu.pipeline_mode<synchronous>, transform_indices = @transform_4, window_bounds = array<i64: 8, 1>}, {pipeline_mode = #tpu.pipeline_mode<synchronous>, transform_indices = @transform_5, window_bounds = array<i64: 8, 1>}, {transform_indices = @transform_6, window_bounds = array<i64: 8, 512>}]} {
    %c0 = arith.constant 0 : index
    %c0_0 = arith.constant 0 : index
    %0 = vector.load %arg2[%c0, %c0_0] : memref<8x1xf32, #tpu.memory_space<vmem>>, vector<8x1xf32>
    %cst = arith.constant 9.765625E-4 : f32
    %1 = vector.broadcast %cst : f32 to vector<8x1xf32>
    %2 = arith.mulf %0, %1 : vector<8x1xf32>
    %c0_1 = arith.constant 0 : index
    %c0_2 = arith.constant 0 : index
    %3 = vector.load %arg3[%c0_1, %c0_2] : memref<8x1xf32, #tpu.memory_space<vmem>>, vector<8x1xf32>
    %cst_3 = arith.constant 9.765625E-4 : f32
    %4 = vector.broadcast %cst_3 : f32 to vector<8x1xf32>
    %5 = arith.mulf %3, %4 : vector<8x1xf32>
    %6 = arith.mulf %2, %2 : vector<8x1xf32>
    %7 = arith.subf %5, %6 : vector<8x1xf32>
    %cst_4 = arith.constant 0.000000e+00 : f32
    %8 = vector.broadcast %cst_4 : f32 to vector<8x1xf32>
    %9 = arith.maximumf %7, %8 : vector<8x1xf32>
    %cst_5 = arith.constant 9.99999974E-6 : f32
    %10 = vector.broadcast %cst_5 : f32 to vector<8x1xf32>
    %11 = arith.addf %9, %10 : vector<8x1xf32>
    %12 = math.rsqrt %11 : vector<8x1xf32>
    %c0_6 = arith.constant 0 : index
    %c0_7 = arith.constant 0 : index
    %13 = vector.load %arg5[%c0_6, %c0_7] : memref<8x1xf32, #tpu.memory_space<vmem>>, vector<8x1xf32>
    %14 = arith.mulf %13, %12 : vector<8x1xf32>
    %c0_8 = arith.constant 0 : index
    %c0_9 = arith.constant 0 : index
    %15 = vector.load %arg6[%c0_8, %c0_9] : memref<8x1xf32, #tpu.memory_space<vmem>>, vector<8x1xf32>
    %c0_10 = arith.constant 0 : index
    %c0_11 = arith.constant 0 : index
    %16 = vector.load %arg4[%c0_10, %c0_11] : memref<8x1xf32, #tpu.memory_space<vmem>>, vector<8x1xf32>
    %17 = arith.addf %2, %16 : vector<8x1xf32>
    %18 = arith.mulf %17, %14 : vector<8x1xf32>
    %19 = arith.subf %15, %18 : vector<8x1xf32>
    %c0_12 = arith.constant 0 : index
    %c0_13 = arith.constant 0 : index
    %20 = vector.load %arg1[%c0_12, %c0_13] : memref<8x512xf32, #tpu.memory_space<vmem>>, vector<8x512xf32>
    %21 = vector.broadcast %14 : vector<8x1xf32> to vector<8x512xf32>
    %22 = arith.mulf %20, %21 : vector<8x512xf32>
    %23 = vector.broadcast %19 : vector<8x1xf32> to vector<8x512xf32>
    %24 = arith.addf %22, %23 : vector<8x512xf32>
    %cst_14 = arith.constant 0.000000e+00 : f32
    %25 = vector.broadcast %cst_14 : f32 to vector<8x512xf32>
    %26 = arith.maximumf %24, %25 : vector<8x512xf32>
    %c0_15 = arith.constant 0 : index
    %c0_16 = arith.constant 0 : index
    %27 = vector.load %arg7[%c0_15, %c0_16] : memref<8x512xf32, #tpu.memory_space<vmem>>, vector<8x512xf32>
    tpu.vector_store %arg7[%c0_15, %c0_16], %26 {strides = array<i32>} : memref<8x512xf32, #tpu.memory_space<vmem>>, vector<8x512xf32>,
    return
  }
  func.func @transform_0(%arg0: i32) -> (i32, i32) {
    %c0_i32 = arith.constant 0 : i32
    %c0_i32_0 = arith.constant 0 : i32
    return %c0_i32, %arg0 : i32, i32
  }
  func.func @transform_1(%arg0: i32) -> (i32, i32) {
    %c0_i32 = arith.constant 0 : i32
    %c0_i32_0 = arith.constant 0 : i32
    %c0_i32_1 = arith.constant 0 : i32
    return %c0_i32, %c0_i32_0 : i32, i32
  }
  func.func @transform_2(%arg0: i32) -> (i32, i32) {
    %c0_i32 = arith.constant 0 : i32
    %c0_i32_0 = arith.constant 0 : i32
    %c0_i32_1 = arith.constant 0 : i32
    return %c0_i32, %c0_i32_0 : i32, i32
  }
  func.func @transform_3(%arg0: i32) -> (i32, i32) {
    %c0_i32 = arith.constant 0 : i32
    %c0_i32_0 = arith.constant 0 : i32
    %c0_i32_1 = arith.constant 0 : i32
    return %c0_i32, %c0_i32_0 : i32, i32
  }
  func.func @transform_4(%arg0: i32) -> (i32, i32) {
    %c0_i32 = arith.constant 0 : i32
    %c0_i32_0 = arith.constant 0 : i32
    %c0_i32_1 = arith.constant 0 : i32
    return %c0_i32, %c0_i32_0 : i32, i32
  }
  func.func @transform_5(%arg0: i32) -> (i32, i32) {
    %c0_i32 = arith.constant 0 : i32
    %c0_i32_0 = arith.constant 0 : i32
    %c0_i32_1 = arith.constant 0 : i32
    return %c0_i32, %c0_i32_0 : i32, i32
  }
  func.func @transform_6(%arg0: i32) -> (i32, i32) {
    %c0_i32 = arith.constant 0 : i32
    %c0_i32_0 = arith.constant 0 : i32
    return %c0_i32, %arg0 : i32, i32
  }
}

</mosaic_0001>

<bundles_post_ra>
// kernel: conv3d_block_forward.3
= control target key start
LH: loop header
LB: loop body
LE: loop exit
PB: predicated region body
PF: predicated region fallthrough
CT: control target
= control target key end

     0   :  { %s433_s21 = smov 0   ;;  %s467_s0 = inlined_call_operand.vmem [shape: f32[8,1024], index: 0, kind: input, shape index: {}]   ;;  %s468_s1 = inlined_call_operand.vmem [shape: f32[8,1], index: 1, kind: input, shape index: {}]   ;;  %s469_s2 = inlined_call_operand.vmem [shape: f32[8,1], index: 2, kind: input, shape index: {}]   ;;  %s470_s3 = inlined_call_operand.vmem [shape: f32[8,1], index: 3, kind: input, shape index: {}]   ;;  %s471_s4 = inlined_call_operand.vmem [shape: f32[8,1], index: 4, kind: input, shape index: {}]   ;;  %s472_s5 = inlined_call_operand.vmem [shape: f32[8,1], index: 5, kind: input, shape index: {}]   ;;  %s473_s6 = inlined_call_operand.vmem [shape: f32[8,1024], index: 6, kind: output, shape index: {}]  }
   0x1 LB: > { %s366_s22 = sadd.s32 4294967295, %s395_s21   ;;  %p370_p0 = scmp.ge.s32.totalorder %s395_s21, 1  ;;  %s395_s21 = sphi %s433_s21, %s16_s21  }
   0x2   : > { %p213_p1 = scmp.lt.s32.totalorder %s395_s21, 3 }
   0x4   : > { %p214_p2 = pnand %p370_p0, %p213_p1 }
   0x5   : > { %s371_s9 = sshll.u32 (!%p214_p2), %s366_s22, 2 }
   0x6   : > { %217 = sbr.rel (%p214_p2) target bundleno = 173 (0xad), region = 44  ;;  %p244_p3 = scmp.lt.s32.totalorder (!%p214_p2), %s371_s9, 7 }
   0xb   : > { %v255_v0 = vld [vmem:[%s468_s1] sm:$0xff]  ;;  %v397_v2 = vmov 0   ;;  %s475_s9 = smov (!%p244_p3, %s371_s9), 7 }
   0xc   : > { %v257_v1 = vld [vmem:[%s469_s2] sm:$0xff]  ;;  %386 = vset.pattern.permute.xlu0 %v397_v2  ;;  %v256_v3 = vmul.f32 0.0009765625, %v255_v0  ;;  %s372_s10 = sshll.u32 %s475_s9, 3 }
   0xd   : > { %v258_v4 = vmul.f32 0.0009765625, %v257_v1  ;;  %v276_v14 = vld [vmem:[%s470_s3] sm:$0xff]  ;;  %s247_s13 = scalar_lea.vmem %s467_s0, %s372_s10  ;;  %s253_s16 = scalar_lea.vmem %s473_s6, %s372_s10 }
   0xe   : > { %v259_v5 = vmul.f32 %v256_v3, %v256_v3  ;;  %v273_v16 = vld [vmem:[%s471_s4] sm:$0xff]  ;;  %v277_v17 = vadd.f32 %v276_v14, %v256_v3  ;;  %v281_v25 = vld [vmem:[%s247_s13 + $0x8] sm:$0xff]  ;;  %v282_v26 = vld [vmem:[%s247_s13 + $0x10] sm:$0xff] }
   0xf   : > { %v275_v21 = vld [vmem:[%s472_s5] sm:$0xff]  ;;  %v283_v27 = vld [vmem:[%s247_s13 + $0x18] sm:$0xff] }
  0x10   : > { %v260_v6 = vsub.f32 %v258_v4, %v259_v5  ;;  %v280_v24 = vld [vmem:[%s247_s13] sm:$0xff] }
  0x12   : > { %v261_v7 = vmax.f32 %v260_v6, 0.0 }
  0x14   : > { %v262_v8 = vadd.f32 1e-05, %v261_v7 }
  0x16   : > { %387 = vrsqrt.f32 %v262_v8  ;;  %vm269_vm0 = vweird.f32 %v262_v8 }
  0x1c   : > { %v388_v9 = vpop.eup %387 }
  0x1d   : > { %v264_v10 = vmul.f32 %v388_v9, %v262_v8  ;;  %vm270_vm1 = vweird.f32 %v388_v9 }
  0x1e   : > { %vm271_vm2 = vmor %vm269_vm0, %vm270_vm1 }
  0x1f   : > { %v265_v11 = vmul.f32 %v388_v9, %v264_v10 }
  0x21   : > { %v266_v12 = vmul.f32 0.5, %v265_v11 }
  0x23   : > { %v267_v13 = vsub.f32 1.5, %v266_v12 }
  0x25   : > { %v268_v15 = vmul.f32 %v388_v9, %v267_v13 }
  0x27   : > { %v272_v18 = vsel %vm271_vm2, %v388_v9, %v268_v15 }
  0x28   : > { %v274_v19 = vmul.f32 %v273_v16, %v272_v18 }
  0x2a   : > { %286 = vperm.xlu0 %386, %v274_v19   ;;  %v278_v20 = vmul.f32 %v277_v17, %v274_v19 }
  0x2c   : > { %v279_v22 = vsub.f32 %v275_v21, %v278_v20 }
  0x32   : > { %295 = vperm.xlu0 %386, %v279_v22  }
  0x9c   : > { %v287_v23 = vpop.permute.xlu0 %286 }
  0x9d   : > { %v289_v28 = vmul.f32 %v287_v23, %v280_v24  ;;  %v290_v29 = vmul.f32 %v287_v23, %v281_v25  ;;  %v291_v30 = vmul.f32 %v287_v23, %v282_v26  ;;  %v292_v32 = vmul.f32 %v287_v23, %v283_v27 }
  0xa4   : > { %v296_v31 = vpop.permute.xlu0 %295 }
  0xa5   : > { %v298_v33 = vadd.f32 %v296_v31, %v289_v28  ;;  %v299_v34 = vadd.f32 %v296_v31, %v290_v29  ;;  %v300_v35 = vadd.f32 %v296_v31, %v291_v30  ;;  %v301_v36 = vadd.f32 %v296_v31, %v292_v32 }
  0xa7   : > { %v302_v37 = vmax.f32 %v298_v33, 0.0  ;;  %v303_v38 = vmax.f32 %v299_v34, 0.0  ;;  %v304_v39 = vmax.f32 %v300_v35, 0.0  ;;  %v305_v40 = vmax.f32 %v301_v36, 0.0 }
  0xa9   : > { %306 = vst [vmem:[%s253_s16] sm:$0xff] %v302_v37 }
  0xaa   : > { %307 = vst [vmem:[%s253_s16 + $0x8] sm:$0xff] %v303_v38 }
  0xab   : > { %308 = vst [vmem:[%s253_s16 + $0x10] sm:$0xff] %v304_v39 }
  0xac   : > { %309 = vst [vmem:[%s253_s16 + $0x18] sm:$0xff] %v305_v40 }
  0xad PF: > { %s16_s21 = sadd.s32 1, %s395_s21  }
  0xae   : > { %p13_p4 = scmp.ge.s32.totalorder %s16_s21, 4  }
  0xb0   :  { %15 = sbr.rel (!%p13_p4) target bundleno = 1 (0x1), region = 74 }

// kernel: conv3d_block_forward.2
= control target key start
LH: loop header
LB: loop body
LE: loop exit
PB: predicated region body
PF: predicated region fallthrough
CT: control target
= control target key end

     0   :  { %s684_s18 = smov 0   ;;  %s686_s19 = smov 0   ;;  %s895_s0 = inlined_call_operand.vmem [shape: f32[8,88], index: 0, kind: input, shape index: {}]   ;;  %s896_s1 = inlined_call_operand.vmem [shape: f32[88,1024], index: 1, kind: input, shape index: {}]   ;;  %s897_s2 = inlined_call_operand.vmem [shape: f32[8,1], index: 2, kind: input, shape index: {}]   ;;  %s898_s3 = inlined_call_operand.vmem [shape: f32[8,1024], index: 3, kind: output, shape index: {0}]   ;;  %s899_s4 = inlined_call_operand.vmem [shape: f32[8,1], index: 4, kind: output, shape index: {1}]   ;;  %s900_s5 = inlined_call_operand.vmem [shape: f32[8,1], index: 5, kind: output, shape index: {2}]  }
   0x1   :  { %s688_s20 = smov 0  }
   0x2 LB: > { %s700_s21 = sadd.s32 4294967295, %s650_s20   ;;  %s703_s22 = sadd.s32 1, %s650_s20   ;;  %s650_s20 = sphi %s688_s20, %s903_s20   ;;  %s646_s19 = sphi %s686_s19, %s902_s19   ;;  %s642_s18 = sphi %s684_s18, %s901_s18  }
   0x3   : > { %s41_s23 = ssub.s32 %s650_s20, %s703_s22  ;;  %s44_s24 = sadd.s32 1, %s646_s19 }
   0x4   : > { %p42_p0 = scmp.eq.s32.totalorder %s41_s23, 0  ;;  %p51_p1 = scmp.ne.s32.totalorder %s646_s19, %s642_s18 }
   0x5   : > { %p52_p2 = scmp.eq.s32.totalorder %s650_s20, 0  ;;  %p584_p4 = scmp.ge.s32.totalorder %s650_s20, 2 }
   0x6   : > { %s712_s25 = scalar_select %p42_p0, %s646_s19, %s44_s24  }
   0x7   : > { %p53_p3 = por %p52_p2, %p51_p1  ;;  %172 = sbr.rel (%p584_p4) target bundleno = 60 (0x3c), region = 24 }
   0xc   : > { %175 = sbr.rel (!%p53_p3) target bundleno = 60 (0x3c), region = 28  ;;  %s177_s26 = sand.u32 (%p53_p3), 1, %s646_s19  }
   0xd   : > { %s598_s27 = sshll.u32 (%p53_p3), %s650_s20, 5  ;;  %s599_s28 = smul.u32 (%p53_p3), 352, %s177_s26 }
   0xe   : > { %s720_s6 = scalar_lea.vmem (%p53_p3), %s896_s1, %s598_s27 }
   0xf   : > { %v195_v0 = vld [vmem:[%s720_s6] sm:$0xff] (%p53_p3)  ;;  %v197_v1 = vld [vmem:[%s720_s6 + $0x8] sm:$0xff] (%p53_p3)  ;;  %v199_v2 = vld [vmem:[%s720_s6 + $0x10] sm:$0xff] (%p53_p3)  ;;  %s725_s7 = scalar_lea.vmem (%p53_p3), [#allocation4], %s599_s28 }
  0x10   : > { %196 = vst [vmem:[%s725_s7] sm:$0xff] (%p53_p3), %v195_v0  ;;  %v201_v3 = vld [vmem:[%s720_s6 + $0x18] sm:$0xff] (%p53_p3)  ;;  %v203_v4 = vld [vmem:[%s720_s6 + $0x40] sm:$0xff] (%p53_p3)  ;;  %v205_v5 = vld [vmem:[%s720_s6 + $0x48] sm:$0xff] (%p53_p3) }
  0x11   : > { %198 = vst [vmem:[%s725_s7 + $0x8] sm:$0xff] %v197_v1  ;;  %v207_v6 = vld [vmem:[%s720_s6 + $0x50] sm:$0xff]  ;;  %v209_v7 = vld [vmem:[%s720_s6 + $0x58] sm:$0xff]  ;;  %v211_v8 = vld [vmem:[%s720_s6 + $0x80] sm:$0xff] }
  0x12   : > { %200 = vst [vmem:[%s725_s7 + $0x10] sm:$0xff] %v199_v2  ;;  %v213_v9 = vld [vmem:[%s720_s6 + $0x88] sm:$0xff]  ;;  %v215_v10 = vld [vmem:[%s720_s6 + $0x90] sm:$0xff]  ;;  %v217_v11 = vld [vmem:[%s720_s6 + $0x98] sm:$0xff] }
  0x13   : > { %202 = vst [vmem:[%s725_s7 + $0x18] sm:$0xff] %v201_v3  ;;  %v219_v12 = vld [vmem:[%s720_s6 + $0xc0] sm:$0xff]  ;;  %v221_v13 = vld [vmem:[%s720_s6 + $0xc8] sm:$0xff]  ;;  %v223_v14 = vld [vmem:[%s720_s6 + $0xd0] sm:$0xff] }
  0x14   : > { %204 = vst [vmem:[%s725_s7 + $0x20] sm:$0xff] %v203_v4  ;;  %v225_v15 = vld [vmem:[%s720_s6 + $0xd8] sm:$0xff]  ;;  %v227_v16 = vld [vmem:[%s720_s6 + $0x100] sm:$0xff]  ;;  %v229_v17 = vld [vmem:[%s720_s6 + $0x108] sm:$0xff] }
  0x15   : > { %206 = vst [vmem:[%s725_s7 + $0x28] sm:$0xff] %v205_v5  ;;  %v231_v18 = vld [vmem:[%s720_s6 + $0x110] sm:$0xff]  ;;  %v233_v19 = vld [vmem:[%s720_s6 + $0x118] sm:$0xff]  ;;  %v235_v20 = vld [vmem:[%s720_s6 + $0x140] sm:$0xff] }
  0x16   : > { %208 = vst [vmem:[%s725_s7 + $0x30] sm:$0xff] %v207_v6  ;;  %v237_v21 = vld [vmem:[%s720_s6 + $0x148] sm:$0xff]  ;;  %v239_v22 = vld [vmem:[%s720_s6 + $0x150] sm:$0xff]  ;;  %v241_v23 = vld [vmem:[%s720_s6 + $0x158] sm:$0xff] }
  0x17   : > { %210 = vst [vmem:[%s725_s7 + $0x38] sm:$0xff] %v209_v7  ;;  %v243_v24 = vld [vmem:[%s720_s6 + $0x180] sm:$0xff]  ;;  %v245_v25 = vld [vmem:[%s720_s6 + $0x188] sm:$0xff]  ;;  %v247_v26 = vld [vmem:[%s720_s6 + $0x190] sm:$0xff] }
  0x18   : > { %212 = vst [vmem:[%s725_s7 + $0x40] sm:$0xff] %v211_v8  ;;  %v249_v27 = vld [vmem:[%s720_s6 + $0x198] sm:$0xff]  ;;  %v251_v28 = vld [vmem:[%s720_s6 + $0x1c0] sm:$0xff]  ;;  %v253_v29 = vld [vmem:[%s720_s6 + $0x1c8] sm:$0xff] }
  0x19   : > { %214 = vst [vmem:[%s725_s7 + $0x48] sm:$0xff] %v213_v9  ;;  %v255_v30 = vld [vmem:[%s720_s6 + $0x1d0] sm:$0xff]  ;;  %v257_v31 = vld [vmem:[%s720_s6 + $0x1d8] sm:$0xff]  ;;  %v259_v32 = vld [vmem:[%s720_s6 + $0x200] sm:$0xff] }
  0x1a   : > { %216 = vst [vmem:[%s725_s7 + $0x50] sm:$0xff] %v215_v10  ;;  %v261_v33 = vld [vmem:[%s720_s6 + $0x208] sm:$0xff]  ;;  %v263_v34 = vld [vmem:[%s720_s6 + $0x210] sm:$0xff]  ;;  %v265_v35 = vld [vmem:[%s720_s6 + $0x218] sm:$0xff] }
  0x1b   : > { %218 = vst [vmem:[%s725_s7 + $0x58] sm:$0xff] %v217_v11  ;;  %v267_v36 = vld [vmem:[%s720_s6 + $0x240] sm:$0xff]  ;;  %v269_v37 = vld [vmem:[%s720_s6 + $0x248] sm:$0xff]  ;;  %v271_v38 = vld [vmem:[%s720_s6 + $0x250] sm:$0xff] }
  0x1c   : > { %220 = vst [vmem:[%s725_s7 + $0x60] sm:$0xff] %v219_v12  ;;  %v273_v39 = vld [vmem:[%s720_s6 + $0x258] sm:$0xff]  ;;  %v275_v40 = vld [vmem:[%s720_s6 + $0x280] sm:$0xff]  ;;  %v277_v41 = vld [vmem:[%s720_s6 + $0x288] sm:$0xff] }
  0x1d   : > { %222 = vst [vmem:[%s725_s7 + $0x68] sm:$0xff] %v221_v13  ;;  %v279_v42 = vld [vmem:[%s720_s6 + $0x290] sm:$0xff]  ;;  %v281_v43 = vld [vmem:[%s720_s6 + $0x298] sm:$0xff] }
  0x1e   : > { %224 = vst [vmem:[%s725_s7 + $0x70] sm:$0xff] %v223_v14 }
  0x1f   : > { %226 = vst [vmem:[%s725_s7 + $0x78] sm:$0xff] %v225_v15 }
  0x20   : > { %228 = vst [vmem:[%s725_s7 + $0x80] sm:$0xff] %v227_v16 }
  0x21   : > { %230 = vst [vmem:[%s725_s7 + $0x88] sm:$0xff] %v229_v17 }
  0x22   : > { %232 = vst [vmem:[%s725_s7 + $0x90] sm:$0xff] %v231_v18 }
  0x23   : > { %234 = vst [vmem:[%s725_s7 + $0x98] sm:$0xff] %v233_v19 }
  0x24   : > { %236 = vst [vmem:[%s725_s7 + $0xa0] sm:$0xff] %v235_v20 }
  0x25   : > { %238 = vst [vmem:[%s725_s7 + $0xa8] sm:$0xff] %v237_v21 }
  0x26   : > { %240 = vst [vmem:[%s725_s7 + $0xb0] sm:$0xff] %v239_v22 }
  0x27   : > { %242 = vst [vmem:[%s725_s7 + $0xb8] sm:$0xff] %v241_v23 }
  0x28   : > { %244 = vst [vmem:[%s725_s7 + $0xc0] sm:$0xff] %v243_v24 }
  0x29   : > { %246 = vst [vmem:[%s725_s7 + $0xc8] sm:$0xff] %v245_v25 }
  0x2a   : > { %248 = vst [vmem:[%s725_s7 + $0xd0] sm:$0xff] %v247_v26 }
  0x2b   : > { %250 = vst [vmem:[%s725_s7 + $0xd8] sm:$0xff] %v249_v27 }
  0x2c   : > { %252 = vst [vmem:[%s725_s7 + $0xe0] sm:$0xff] %v251_v28 }
  0x2d   : > { %254 = vst [vmem:[%s725_s7 + $0xe8] sm:$0xff] %v253_v29 }
  0x2e   : > { %256 = vst [vmem:[%s725_s7 + $0xf0] sm:$0xff] %v255_v30 }
  0x2f   : > { %258 = vst [vmem:[%s725_s7 + $0xf8] sm:$0xff] %v257_v31 }
  0x30   : > { %260 = vst [vmem:[%s725_s7 + $0x100] sm:$0xff] %v259_v32 }
  0x31   : > { %262 = vst [vmem:[%s725_s7 + $0x108] sm:$0xff] %v261_v33 }
  0x32   : > { %264 = vst [vmem:[%s725_s7 + $0x110] sm:$0xff] %v263_v34 }
  0x33   : > { %266 = vst [vmem:[%s725_s7 + $0x118] sm:$0xff] %v265_v35 }
  0x34   : > { %268 = vst [vmem:[%s725_s7 + $0x120] sm:$0xff] %v267_v36 }
  0x35   : > { %270 = vst [vmem:[%s725_s7 + $0x128] sm:$0xff] %v269_v37 }
  0x36   : > { %272 = vst [vmem:[%s725_s7 + $0x130] sm:$0xff] %v271_v38 }
  0x37   : > { %274 = vst [vmem:[%s725_s7 + $0x138] sm:$0xff] %v273_v39 }
  0x38   : > { %276 = vst [vmem:[%s725_s7 + $0x140] sm:$0xff] %v275_v40 }
  0x39   : > { %278 = vst [vmem:[%s725_s7 + $0x148] sm:$0xff] %v277_v41 }
  0x3a   : > { %280 = vst [vmem:[%s725_s7 + $0x150] sm:$0xff] %v279_v42 }
  0x3b   : > { %282 = vst [vmem:[%s725_s7 + $0x158] sm:$0xff] %v281_v43 }
  0x3c PF: > { %p587_p5 = scmp.ge.s32.totalorder %s650_s20, 1  ;;  %p287_p6 = scmp.lt.s32.totalorder %s650_s20, 3 }
  0x3e   : > { %p288_p7 = pnand %p587_p5, %p287_p6 }
  0x3f   : > { %s294_s8 = sand.u32 (!%p288_p7), 1, %s642_s18   ;;  %s588_s9 = sshll.u32 (!%p288_p7), %s700_s21, 2 }
  0x40   : > { %291 = sbr.rel (%p288_p7) target bundleno = 364 (0x16c), region = 51  ;;  %p323_p8 = scmp.lt.s32.totalorder (!%p288_p7), %s588_s9, 7 }
  0x41   : > { %s600_s10 = smul.u32 (!%p288_p7), 352, %s294_s8  ;;  %p590_p9 = scmp.ne.s32.totalorder (!%p288_p7), %s700_s21, 0 }
  0x43   : > { %s821_s15 = scalar_lea.vmem (!%p288_p7), [#allocation4], %s600_s10 }
  0x45   : > { %s905_s9 = smov (!%p323_p8, %s588_s9), 7  ;;  %331 = sbr.rel (%p590_p9) target bundleno = 77 (0x4d), region = 59 }
  0x46   : > { %s589_s11 = sshll.u32 %s905_s9, 3 }
  0x47   : > { %s819_s14 = scalar_lea.vmem %s898_s3, %s589_s11 }
  0x4a   : > { %vm332_vm0 = vcmask 7168   ;;  %v652_v44 = vmov 0.0  }
  0x4b   : > { %333 = vst.msk [vmem:[#allocation2] sm:$0xff] %vm332_vm0, %v652_v44 }
  0x4c   : > { %334 = vst.msk [vmem:[#allocation3] sm:$0xff] %vm332_vm0, %v652_v44 }
  0x4d PF: > { %v378_v45 = vld [vmem:[%s821_s15 + $0x150] sm:$0xff]  ;;  %v379_v47 = vld [vmem:[%s821_s15 + $0x158] sm:$0xff]  ;;  %v376_v48 = vld [vmem:[%s821_s15 + $0x140] sm:$0xff]  ;;  %vm380_vm1 = vcmask 719872   ;;  %v653_v27 = vmov 0   ;;  %vm471_vm2 = vcmask 7168  }
  0x4e   : > { %v374_v46 = vld [vmem:[%s821_s15 + $0x130] sm:$0xff]  ;;  %429 = vmatpush.msra.mxu2 %v378_v45  ;;  %449 = vmatpush.msra.mxu3 %v379_v47  ;;  %v377_v49 = vld [vmem:[%s821_s15 + $0x148] sm:$0xff]  ;;  %v375_v51 = vld [vmem:[%s821_s15 + $0x138] sm:$0xff]  ;;  %p595_p10 = scmp.ne.s32.totalorder %s700_s21, 1 }
  0x4f   : > { %v370_v50 = vld [vmem:[%s821_s15 + $0x110] sm:$0xff]  ;;  %389 = vmatpush.msra.mxu0 %v376_v48  ;;  %409 = vmatpush.msra.mxu1 %v377_v49  ;;  %v372_v52 = vld [vmem:[%s821_s15 + $0x120] sm:$0xff]  ;;  %v373_v53 = vld [vmem:[%s821_s15 + $0x128] sm:$0xff] }
  0x50   : > { %430 = vmatpush.msra.mxu2 %v374_v46  ;;  %450 = vmatpush.msra.mxu3 %v375_v51  ;;  %v371_v54 = vld [vmem:[%s821_s15 + $0x118] sm:$0xff]  ;;  %v368_v55 = vld [vmem:[%s821_s15 + $0x100] sm:$0xff]  ;;  %v366_v56 = vld [vmem:[%s821_s15 + $0xf0] sm:$0xff] }
  0x51   : > { %390 = vmatpush.msra.mxu0 %v372_v52  ;;  %410 = vmatpush.msra.mxu1 %v373_v53  ;;  %v369_v57 = vld [vmem:[%s821_s15 + $0x108] sm:$0xff]  ;;  %v367_v58 = vld [vmem:[%s821_s15 + $0xf8] sm:$0xff]  ;;  %v364_v59 = vld [vmem:[%s821_s15 + $0xe0] sm:$0xff] }
  0x52   : > { %431 = vmatpush.msra.mxu2 %v370_v50  ;;  %451 = vmatpush.msra.mxu3 %v371_v54  ;;  %v365_v60 = vld [vmem:[%s821_s15 + $0xe8] sm:$0xff]  ;;  %v362_v61 = vld [vmem:[%s821_s15 + $0xd0] sm:$0xff]  ;;  %v363_v62 = vld [vmem:[%s821_s15 + $0xd8] sm:$0xff] }
  0x53   : > { %391 = vmatpush.msra.mxu0 %v368_v55  ;;  %411 = vmatpush.msra.mxu1 %v369_v57  ;;  %v360_v63 = vld [vmem:[%s821_s15 + $0xc0] sm:$0xff]  ;;  %v361_v0 = vld [vmem:[%s821_s15 + $0xc8] sm:$0xff]  ;;  %v358_v1 = vld [vmem:[%s821_s15 + $0xb0] sm:$0xff] }
  0x54   : > { %432 = vmatpush.msra.mxu2 %v366_v56  ;;  %452 = vmatpush.msra.mxu3 %v367_v58  ;;  %v359_v2 = vld [vmem:[%s821_s15 + $0xb8] sm:$0xff]  ;;  %v356_v3 = vld [vmem:[%s821_s15 + $0xa0] sm:$0xff]  ;;  %v357_v4 = vld [vmem:[%s821_s15 + $0xa8] sm:$0xff] }
  0x55   : > { %392 = vmatpush.msra.mxu0 %v364_v59  ;;  %412 = vmatpush.msra.mxu1 %v365_v60  ;;  %v354_v5 = vld [vmem:[%s821_s15 + $0x90] sm:$0xff]  ;;  %v355_v6 = vld [vmem:[%s821_s15 + $0x98] sm:$0xff]  ;;  %v352_v7 = vld [vmem:[%s821_s15 + $0x80] sm:$0xff] }
  0x56   : > { %433 = vmatpush.msra.mxu2 %v362_v61  ;;  %453 = vmatpush.msra.mxu3 %v363_v62  ;;  %v353_v8 = vld [vmem:[%s821_s15 + $0x88] sm:$0xff]  ;;  %v350_v9 = vld [vmem:[%s821_s15 + $0x70] sm:$0xff]  ;;  %v351_v10 = vld [vmem:[%s821_s15 + $0x78] sm:$0xff] }
  0x57   : > { %393 = vmatpush.msra.mxu0 %v360_v63  ;;  %413 = vmatpush.msra.mxu1 %v361_v0  ;;  %v348_v11 = vld [vmem:[%s821_s15 + $0x60] sm:$0xff]  ;;  %v349_v12 = vld [vmem:[%s821_s15 + $0x68] sm:$0xff]  ;;  %v346_v13 = vld [vmem:[%s821_s15 + $0x50] sm:$0xff] }
  0x58   : > { %434 = vmatpush.msra.mxu2 %v358_v1  ;;  %454 = vmatpush.msra.mxu3 %v359_v2  ;;  %v347_v14 = vld [vmem:[%s821_s15 + $0x58] sm:$0xff]  ;;  %v344_v15 = vld [vmem:[%s821_s15 + $0x40] sm:$0xff]  ;;  %v345_v16 = vld [vmem:[%s821_s15 + $0x48] sm:$0xff] }
  0x59   : > { %394 = vmatpush.msra.mxu0 %v356_v3  ;;  %414 = vmatpush.msra.mxu1 %v357_v4  ;;  %v342_v17 = vld [vmem:[%s821_s15 + $0x30] sm:$0xff]  ;;  %v343_v18 = vld [vmem:[%s821_s15 + $0x38] sm:$0xff]  ;;  %v340_v19 = vld [vmem:[%s821_s15 + $0x20] sm:$0xff] }
  0x5a   : > { %435 = vmatpush.msra.mxu2 %v354_v5  ;;  %455 = vmatpush.msra.mxu3 %v355_v6  ;;  %v341_v20 = vld [vmem:[%s821_s15 + $0x28] sm:$0xff]  ;;  %v338_v21 = vld [vmem:[%s821_s15 + $0x10] sm:$0xff]  ;;  %v339_v22 = vld [vmem:[%s821_s15 + $0x18] sm:$0xff] }
  0x5b   : > { %395 = vmatpush.msra.mxu0 %v352_v7  ;;  %415 = vmatpush.msra.mxu1 %v353_v8  ;;  %v335_v23 = vld [vmem:[%s895_s0] sm:$0xff]  ;;  %v336_v24 = vld [vmem:[%s821_s15] sm:$0xff]  ;;  %v337_v25 = vld [vmem:[%s821_s15 + $0x8] sm:$0xff] }
  0x5c   : > { %436 = vmatpush.msra.mxu2 %v350_v9  ;;  %456 = vmatpush.msra.mxu3 %v351_v10  ;;  %v485_v26 = vld [vmem:[%s897_s2] sm:$0xff]  ;;  %v473_v49 = vld [vmem:[#allocation3] sm:$0xff] }
  0x5d   : > { %396 = vmatpush.msra.mxu0 %v348_v11  ;;  %416 = vmatpush.msra.mxu1 %v349_v12  ;;  %v464_v47 = vld [vmem:[#allocation2] sm:$0xff] }
  0x5e   : > { %437 = vmatpush.msra.mxu2 %v346_v13  ;;  %457 = vmatpush.msra.mxu3 %v347_v14 }
  0x5f   : > { %397 = vmatpush.msra.mxu0 %v344_v15  ;;  %417 = vmatpush.msra.mxu1 %v345_v16 }
  0x60   : > { %438 = vmatpush.msra.mxu2 %v342_v17  ;;  %458 = vmatpush.msra.mxu3 %v343_v18 }
  0x61   : > { %398 = vmatpush.msra.mxu0 %v340_v19  ;;  %418 = vmatpush.msra.mxu1 %v341_v20 }
  0x62   : > { %439 = vmatpush.msra.mxu2 %v338_v21  ;;  %459 = vmatpush.msra.mxu3 %v339_v22 }
  0x63   : > { %593 = vmatmul.msk.f32.vlgmr.msra.gmra.mxu2 %vm380_vm1, %v335_v23  ;;  %399 = vmatpush.msra.mxu0 %v336_v24 }
  0x64   : > { %594 = vmatmul.msk.f32.vlgmr.msra.gmra.mxu3 %vm380_vm1, %v335_v23  ;;  %591 = vmatmul.msk.f32.vlgmr.msra.gmra.mxu0 %vm380_vm1, %v335_v23 }
  0x65   : > { %419 = vmatpush.msra.mxu1 %v337_v25  ;;  %627 = vset.pattern.permute.xlu0 %v653_v27 }
  0x66   : > { %592 = vmatmul.msk.f32.vlgmr.msra.gmra.mxu1 %vm380_vm1, %v335_v23  ;;  %488 = vperm.xlu0 %627, %v485_v26  }
  0xd8   : > { %v489_v28 = vpop.permute.xlu0 %488 }
  0xe1   : > { %v401_v29 = vpop.f32.mrf.mxu0 }
  0xe2   : > { %v474_v30 = vmul.f32 %v401_v29, %v401_v29  ;;  %v491_v31 = vadd.f32 %v489_v28, %v401_v29 }
  0xe3   : > { %v421_v32 = vpop.f32.mrf.mxu1 }
  0xe4   : > { %495 = vst [vmem:[%s819_s14] sm:$0xff] %v491_v31  ;;  %v465_v33 = vadd.f32 %v421_v32, %v401_v29  ;;  %v475_v34 = vmul.f32 %v421_v32, %v421_v32  ;;  %v492_v35 = vadd.f32 %v489_v28, %v421_v32 }
  0xe6   : > { %v478_v36 = vadd.f32 %v475_v34, %v474_v30  ;;  %496 = vst [vmem:[%s819_s14 + $0x8] sm:$0xff] %v492_v35  ;;  %v441_v37 = vpop.f32.mrf.mxu2 }
  0xe7   : > { %v466_v38 = vadd.f32 %v465_v33, %v441_v37  ;;  %v476_v39 = vmul.f32 %v441_v37, %v441_v37  ;;  %v493_v40 = vadd.f32 %v489_v28, %v441_v37  ;;  %v461_v41 = vpop.f32.mrf.mxu3 }
  0xe8   : > { %v477_v42 = vmul.f32 %v461_v41, %v461_v41  ;;  %v494_v43 = vadd.f32 %v489_v28, %v461_v41 }
  0xe9   : > { %497 = vst [vmem:[%s819_s14 + $0x10] sm:$0xff] %v493_v40  ;;  %v467_v44 = vadd.f32 %v466_v38, %v461_v41  ;;  %v479_v45 = vadd.f32 %v478_v36, %v476_v39 }
  0xea   : > { %498 = vst [vmem:[%s819_s14 + $0x18] sm:$0xff] %v494_v43 }
  0xeb   : > { %468 = vadd.xlane.f32.xlu0 %v467_v44  ;;  %v480_v46 = vadd.f32 %v479_v45, %v477_v42 }
  0xed   : > { %481 = vadd.xlane.f32.xlu1 %v480_v46 }
 0x15e   : > { %v469_v48 = vpop.xlane.xlu0 %468 }
 0x15f   : > { %v470_v50 = vadd.f32 %v469_v48, %v464_v47  ;;  %502 = sbr.rel (%p595_p10) target bundleno = 364 (0x16c), region = 63 }
 0x160   : > { %v482_v51 = vpop.xlane.xlu1 %481 }
 0x161   : > { %472 = vst.msk [vmem:[#allocation2] sm:$0xff] %vm471_vm2, %v470_v50  ;;  %v483_v52 = vadd.f32 %v482_v51, %v473_v49 }
 0x163   : > { %484 = vst.msk [vmem:[#allocation3] sm:$0xff] %vm471_vm2, %v483_v52 }
 0x168   : > { %v503_v53 = vld [vmem:[#allocation2] sm:$0xff] }
 0x169   : > { %504 = vst.msk [vmem:[%s899_s4] sm:$0xff] %vm471_vm2, %v503_v53 }
 0x16a   : > { %v505_v54 = vld [vmem:[#allocation3] sm:$0xff] }
 0x16b   : > { %506 = vst.msk [vmem:[%s900_s5] sm:$0xff] %vm471_vm2, %v505_v54 }
 0x16c PF: > { %p13_p11 = scmp.ge.s32.totalorder %s703_s22, 4   ;;  %s901_s18 = smov %s646_s19 }
 0x16d   : > { %s902_s19 = smov %s712_s25  ;;  %s903_s20 = smov %s703_s22 }
 0x16e   :  { %15 = sbr.rel (!%p13_p11) target bundleno = 2 (0x2), region = 114 }

</bundles_post_ra>
